<compile_context>
chip_gen: v5e
topology: v5e:2x2
jax: 0.10.0
libtpu: 0.0.40
codegen_flags: <defaults>
</compile_context>

<pallas_src>
import functools
import math

import jax
import jax.numpy as jnp
from jax import lax
from jax.experimental import pallas as pl
from jax.experimental.pallas import tpu as pltpu

_TILE_BYTES = 8 * 1024 * 1024  # per x buffer; double-buffered; vmem_limit_bytes set explicitly


def _round_up(a, b):
    return ((a + b - 1) // b) * b


def _network_kernel(x_ref, wf_ref, scal_ref, o_ref):
    # x_ref   : (RT, PD)     packed activations (P batch rows per lane-aligned row)
    # wf_ref  : (P_pad, PD)  block-diagonal replication of w1 (resident in VMEM)
    # scal_ref: (3,) SMEM    [b1, w2, b2]
    # o_ref   : (P_pad, RT)  lane-dense output, o[p, r] = y[r*P + p]
    x = x_ref[...].astype(jnp.float32)
    wf = wf_ref[...]
    b1 = scal_ref[0]
    w2 = scal_ref[1]
    b2 = scal_ref[2]

    # h[p, r] = sum_l wf[p, l] * x[r, l]  ==  x[r*P + p] . w1   (Linear(D, 1))
    # "NT" dot_general (transposed rhs) -> batch ends up on the lane axis.
    h = lax.dot_general(wf, x, (((1,), (1,)), ((), ())),
                        preferred_element_type=jnp.float32)     # (P_pad, RT)
    h = h + b1
    h = 1.0 / (1.0 + jnp.exp(-h))      # exact Sigmoid (mem-bound: exact rcp is free)
    h = h * w2 + b2                    # Linear(1, 1)
    h = 1.0 / (1.0 + jnp.exp(-h))      # Sigmoid
    o_ref[...] = h.astype(o_ref.dtype)


def _xla_tail(x_part, w1, b1, w2, b2, out_dtype):
    # Plain-XLA path for the < P ragged remainder rows (tiny).
    h = x_part.astype(jnp.float32) @ w1.astype(jnp.float32).T
    h = h + b1.astype(jnp.float32).reshape(())
    h = jax.nn.sigmoid(h)
    h = h * w2.astype(jnp.float32).reshape(()) + b2.astype(jnp.float32).reshape(())
    return jax.nn.sigmoid(h).astype(out_dtype)


@functools.partial(jax.jit, static_argnames=("tile_bytes",))
def network_model_forward(x, w1, b1, w2, b2, *, tile_bytes=_TILE_BYTES):
    """Forward pass of Network_model([D, 1, 1]) as a single tiled Pallas kernel."""
    B, D = x.shape
    x_item = jnp.dtype(x.dtype).itemsize

    # Lane packing: P batch rows per packed row so P*D is a multiple of 128
    # (lane-dense loads for any D, not just divisors of 128).
    P = 128 // math.gcd(D, 128)
    while P > 1 and P * D * x_item * 128 > tile_bytes:   # guard for very large D
        P //= 2
    PD = P * D
    min_sub = max(8, 32 // x_item)          # sublane granule: f32 -> 8, bf16 -> 16
    P_pad = _round_up(P, min_sub)

    B_main = (B // P) * P                   # rows handled by the kernel
    B_tail = B - B_main                     # < P ragged rows handled by plain XLA

    outs = []
    if B_main > 0:
        # Zero-copy packing when B % P == 0 (the common case): reshape is a bitcast.
        # TODO(synk): for ragged B the leading slice may cost one extra HBM pass;
        # could be removed with CompilerParams(allow_input_fusion=...) if it shows up.
        x_main = x if B_tail == 0 else x[:B_main]
        R = B_main // P
        x_packed = x_main.reshape(R, PD)

        # ---- tiling policy --------------------------------------------------
        # Largest tile under the per-buffer budget, rounded to 128 packed rows.
        rt_cap = max(128, (tile_bytes // (PD * x_item)) // 128 * 128)
        # v7x has 2 TensorCores: force >= 2 grid steps on the "parallel" axis
        # whenever there is enough work, so both cores stream from HBM.
        if R >= 256:
            rt_cap = min(rt_cap, max(128, (R // 2) // 128 * 128))
        T = -(-R // rt_cap)
        RT = _round_up(-(-R // T), 128)     # balanced tiles, no near-empty last step
        T = -(-R // RT)

        # Scoped-VMEM budget: 2x x-tile + 2x out-tile + weights + margin.
        # ~25 MiB at the default tile size -> fits v5e/v6e/v7x when set explicitly.
        vmem_limit = int(2 * RT * PD * x_item + 2 * P_pad * RT * x_item
                         + 2 * P_pad * PD * 4 + (8 << 20))

        # wfold[p, q*D + d] = w1[d] if q == p else 0   (rows >= P are zero padding)
        w1f = w1.astype(jnp.float32).reshape(D)
        eye = jnp.eye(P_pad, P, dtype=jnp.float32)
        wfold = (eye[:, :, None] * w1f[None, None, :]).reshape(P_pad, PD)

        scal = jnp.stack([b1.reshape(()), w2.reshape(()), b2.reshape(())]).astype(jnp.float32)

        out = pl.pallas_call(
            _network_kernel,
            out_shape=jax.ShapeDtypeStruct((P_pad, T * RT), x.dtype),
            grid=(T,),
            in_specs=[
                pl.BlockSpec((RT, PD), lambda i: (i, 0)),            # streamed batch tiles
                pl.BlockSpec((P_pad, PD), lambda i: (0, 0)),         # folded w1, resident
                pl.BlockSpec(memory_space=pltpu.MemorySpace.SMEM),   # scalars b1, w2, b2
            ],
            out_specs=pl.BlockSpec((P_pad, RT), lambda i: (0, i)),   # lane-dense output slab
            compiler_params=pltpu.CompilerParams(
                dimension_semantics=("parallel",),
                vmem_limit_bytes=vmem_limit,
            ),
        )(x_packed, wfold, scal)

        # out[p, g] = y[g*P + p]  ->  restore batch order, drop padded rows/cols.
        outs.append(out[:P, :R].T.reshape(B_main, 1))

    if B_tail > 0:
        outs.append(_xla_tail(x[B_main:], w1, b1, w2, b2, x.dtype))

    return outs[0] if len(outs) == 1 else jnp.concatenate(outs, axis=0)


def init_params(key, layer_lst):
    """Deterministic PyTorch-Linear-style init (uniform(-1/sqrt(fan_in), +1/sqrt(fan_in)))."""
    assert layer_lst == [layer_lst[0], 1, 1], "only the runnable [D, 1, 1] config is supported"
    D = layer_lst[0]
    k1, k2, k3, k4 = jax.random.split(key, 4)
    lim1 = 1.0 / jnp.sqrt(D)
    w1 = jax.random.uniform(k1, (1, D), jnp.float32, -lim1, lim1)   # Linear(D, 1).weight
    b1 = jax.random.uniform(k2, (1, 1), jnp.float32, -lim1, lim1)   # Linear(D, 1).bias
    w2 = jax.random.uniform(k3, (1, 1), jnp.float32, -1.0, 1.0)     # Linear(1, 1).weight
    b2 = jax.random.uniform(k4, (1, 1), jnp.float32, -1.0, 1.0)     # Linear(1, 1).bias
    return w1, b1, w2, b2


def reference_forward(x, w1, b1, w2, b2):
    h = x @ w1.T + b1[0, 0]
    h = jax.nn.sigmoid(h)
    h = h * w2[0, 0] + b2[0, 0]
    return jax.nn.sigmoid(h)


if __name__ == "__main__":
    key = jax.random.PRNGKey(0)
    layer_lst = [32, 1, 1]          # D=32 features, Linear(D,1)+Sigmoid, Linear(1,1)+Sigmoid
    D = layer_lst[0]
    kp, kx1, kx2, kx3 = jax.random.split(key, 4)
    w1, b1, w2, b2 = init_params(kp, layer_lst)

    # 1) Small test matching the module's toy usage (single partial tile).
    B = 8
    x = jax.random.normal(kx1, (B, D), jnp.float32)
    out = jax.block_until_ready(network_model_forward(x, w1, b1, w2, b2))
    ref = reference_forward(x, w1, b1, w2, b2)
    assert out.shape == (B, 1)
    assert jnp.allclose(out, ref, atol=1e-4, rtol=1e-4), float(jnp.max(jnp.abs(out - ref)))

    # 2) Multi-tile grid path (tiny tile budget forces several grid steps).
    B2 = 2048
    x2 = jax.random.normal(kx2, (B2, D), jnp.float32)
    out2 = jax.block_until_ready(
        network_model_forward(x2, w1, b1, w2, b2, tile_bytes=64 * 1024))
    ref2 = reference_forward(x2, w1, b1, w2, b2)
    assert out2.shape == (B2, 1)
    assert jnp.allclose(out2, ref2, atol=1e-4, rtol=1e-4), float(jnp.max(jnp.abs(out2 - ref2)))

    # 3) Ragged batch (B % P != 0): kernel main slab + tiny XLA tail, no full pad copy.
    B3 = 2051
    x3 = jax.random.normal(kx3, (B3, D), jnp.float32)
    out3 = jax.block_until_ready(network_model_forward(x3, w1, b1, w2, b2))
    ref3 = reference_forward(x3, w1, b1, w2, b2)
    assert out3.shape == (B3, 1)
    assert jnp.allclose(out3, ref3, atol=1e-4, rtol=1e-4), float(jnp.max(jnp.abs(out3 - ref3)))

    # 4) bf16 input streamed end-to-end (halves HBM bytes when the producer is bf16).
    xb = x2.astype(jnp.bfloat16)
    outb = jax.block_until_ready(network_model_forward(xb, w1, b1, w2, b2))
    refb = reference_forward(xb.astype(jnp.float32), w1, b1, w2, b2)
    assert outb.shape == (B2, 1)
    assert jnp.allclose(outb.astype(jnp.float32), refb, atol=3e-2, rtol=3e-2)

    print("KERNEL_OK")
</pallas_src>

<mosaic_0001>
module attributes {stable_mosaic.version = 11 : i64} {
  func.func @_network_kernel(%arg0: i32, %arg1: memref<128x128xf32, #tpu.memory_space<vmem>>, %arg2: memref<8x128xf32, #tpu.memory_space<vmem>>, %arg3: memref<3xf32, #tpu.memory_space<smem>>, %arg4: memref<8x128xf32, #tpu.memory_space<vmem>>) attributes {dimension_semantics = [#tpu.dimension_semantics<parallel>], iteration_bounds = array<i64: 1>, scalar_prefetch = 0 : i64, scratch_operands = 0 : i64, tpu.core_type = #tpu.core_type<tc>, window_params = [{transform_indices = @transform_0, window_bounds = array<i64: 128, 128>}, {pipeline_mode = #tpu.pipeline_mode<synchronous>, transform_indices = @transform_1, window_bounds = array<i64: 8, 128>}, {transform_indices = @transform_2, window_bounds = array<i64: 3>}, {transform_indices = @transform_3, window_bounds = array<i64: 8, 128>}]} {
    %c0 = arith.constant 0 : index
    %c0_0 = arith.constant 0 : index
    %0 = vector.load %arg1[%c0, %c0_0] : memref<128x128xf32, #tpu.memory_space<vmem>>, vector<128x128xf32>
    %c0_1 = arith.constant 0 : index
    %c0_2 = arith.constant 0 : index
    %1 = vector.load %arg2[%c0_1, %c0_2] : memref<8x128xf32, #tpu.memory_space<vmem>>, vector<8x128xf32>
    %c0_3 = arith.constant 0 : index
    %2 = memref.load %arg3[%c0_3] : memref<3xf32, #tpu.memory_space<smem>>
    %c1 = arith.constant 1 : index
    %3 = memref.load %arg3[%c1] : memref<3xf32, #tpu.memory_space<smem>>
    %c2 = arith.constant 2 : index
    %4 = memref.load %arg3[%c2] : memref<3xf32, #tpu.memory_space<smem>>
    %cst = arith.constant dense<0.000000e+00> : vector<8x128xf32>
    %5 = tpu.matmul %1, %0, %cst {dimension_numbers = #tpu.dot_dimension_numbers<[1], [1], [0], [0], [0, 0, 1, 0], [], []>} : vector<8x128xf32>, vector<128x128xf32>, vector<8x128xf32> -> vector<8x128xf32>
    %6 = vector.broadcast %2 : f32 to vector<8x128xf32>
    %7 = arith.addf %5, %6 : vector<8x128xf32>
    %cst_4 = arith.constant 0.000000e+00 : f32
    %8 = vector.broadcast %cst_4 : f32 to vector<8x128xf32>
    %9 = arith.subf %8, %7 : vector<8x128xf32>
    %10 = math.exp %9 : vector<8x128xf32>
    %cst_5 = arith.constant 1.000000e+00 : f32
    %11 = vector.broadcast %cst_5 : f32 to vector<8x128xf32>
    %12 = arith.addf %11, %10 : vector<8x128xf32>
    %cst_6 = arith.constant 1.000000e+00 : f32
    %13 = vector.broadcast %cst_6 : f32 to vector<8x128xf32>
    %14 = arith.divf %13, %12 : vector<8x128xf32>
    %15 = vector.broadcast %3 : f32 to vector<8x128xf32>
    %16 = arith.mulf %14, %15 : vector<8x128xf32>
    %17 = vector.broadcast %4 : f32 to vector<8x128xf32>
    %18 = arith.addf %16, %17 : vector<8x128xf32>
    %cst_7 = arith.constant 0.000000e+00 : f32
    %19 = vector.broadcast %cst_7 : f32 to vector<8x128xf32>
    %20 = arith.subf %19, %18 : vector<8x128xf32>
    %21 = math.exp %20 : vector<8x128xf32>
    %cst_8 = arith.constant 1.000000e+00 : f32
    %22 = vector.broadcast %cst_8 : f32 to vector<8x128xf32>
    %23 = arith.addf %22, %21 : vector<8x128xf32>
    %cst_9 = arith.constant 1.000000e+00 : f32
    %24 = vector.broadcast %cst_9 : f32 to vector<8x128xf32>
    %25 = arith.divf %24, %23 : vector<8x128xf32>
    %c0_10 = arith.constant 0 : index
    %c0_11 = arith.constant 0 : index
    %26 = vector.load %arg4[%c0_10, %c0_11] : memref<8x128xf32, #tpu.memory_space<vmem>>, vector<8x128xf32>
    tpu.vector_store %arg4[%c0_10, %c0_11], %25 {strides = array<i32>} : memref<8x128xf32, #tpu.memory_space<vmem>>, vector<8x128xf32>,
    return
  }
  func.func @transform_0(%arg0: i32) -> (i32, i32) {
    %c0_i32 = arith.constant 0 : i32
    %c0_i32_0 = arith.constant 0 : i32
    return %arg0, %c0_i32 : i32, i32
  }
  func.func @transform_1(%arg0: i32) -> (i32, i32) {
    %c0_i32 = arith.constant 0 : i32
    %c0_i32_0 = arith.constant 0 : i32
    %c0_i32_1 = arith.constant 0 : i32
    return %c0_i32, %c0_i32_0 : i32, i32
  }
  func.func @transform_2(%arg0: i32) -> i32 {
    %c0_i32 = arith.constant 0 : i32
    %c0_i32_0 = arith.constant 0 : i32
    return %c0_i32 : i32
  }
  func.func @transform_3(%arg0: i32) -> (i32, i32) {
    %c0_i32 = arith.constant 0 : i32
    %c0_i32_0 = arith.constant 0 : i32
    return %c0_i32, %arg0 : i32, i32
  }
}

</mosaic_0001>

<bundles_post_ra>
// kernel: network_model_forward.1
= control target key start
LH: loop header
LB: loop body
LE: loop exit
PB: predicated region body
PF: predicated region fallthrough
CT: control target
= control target key end

     0   :  { %8 = vsyncpa [#allocation3], 0  ;;  %s141_s15 = smov [#allocation2]   ;;  %s219_s0 = inlined_call_operand.vmem [shape: f32[2,128], index: 0, kind: input, shape index: {}]   ;;  %s220_s1 = inlined_call_operand.vmem [shape: f32[8,128], index: 1, kind: input, shape index: {}]   ;;  %s221_s2 = inlined_call_operand.vmem [shape: f32[3], index: 2, kind: input, shape index: {}]   ;;  %s222_s3 = inlined_call_operand.vmem [shape: f32[8,128], index: 3, kind: output, shape index: {}]  }
   0x1   :  { %s18_s14 = sshll.u32 %s221_s2, 4  ;;  %s19_s14 = int_to_ptr.vmem [resolvable:$true] %s18_s14 }
   0x2   :  { %21 = dma.vmem_to_smem %s19_s14, 16, %s141_s15, [#allocation3]  }
   0x3   :  { %139 = dma.done.wait [#allocation3], 16  }
   0x4   :  { %140 = vsyncadd [#allocation3], 4294967280 }
   0x5   :  { %26 = sfence }
   0x6   :  { %v42_v0 = vld [vmem:[%s219_s0 + $0x78] sm:$0xff]  ;;  %v41_v1 = vld [vmem:[%s219_s0 + $0x70] sm:$0xff]  ;;  %v40_v2 = vld [vmem:[%s219_s0 + $0x68] sm:$0xff]  ;;  %s44_s2 = sld [smem:[#allocation2]] }
   0x7   :  { %48 = vmatpush.xpose.msra.mxu0 %v42_v0  ;;  %v39_v3 = vld [vmem:[%s219_s0 + $0x60] sm:$0xff]  ;;  %v38_v4 = vld [vmem:[%s219_s0 + $0x58] sm:$0xff]  ;;  %v37_v5 = vld [vmem:[%s219_s0 + $0x50] sm:$0xff]  ;;  %s116_s22 = sld [smem:[#allocation2 + $0x1]] }
   0x8   :  { %v36_v6 = vld [vmem:[%s219_s0 + $0x48] sm:$0xff]  ;;  %v35_v7 = vld [vmem:[%s219_s0 + $0x40] sm:$0xff]  ;;  %v34_v8 = vld [vmem:[%s219_s0 + $0x38] sm:$0xff] }
   0x9   :  { %v33_v9 = vld [vmem:[%s219_s0 + $0x30] sm:$0xff]  ;;  %v32_v10 = vld [vmem:[%s219_s0 + $0x28] sm:$0xff]  ;;  %v31_v11 = vld [vmem:[%s219_s0 + $0x20] sm:$0xff] }
   0xa   :  { %v30_v12 = vld [vmem:[%s219_s0 + $0x18] sm:$0xff]  ;;  %v29_v13 = vld [vmem:[%s219_s0 + $0x10] sm:$0xff]  ;;  %v28_v14 = vld [vmem:[%s219_s0 + $0x8] sm:$0xff] }
   0xb   :  { %49 = vmatpush.xpose.msra.mxu0 %v41_v1  ;;  %v27_v15 = vld [vmem:[%s219_s0] sm:$0xff]  ;;  %s117_s0 = sld [smem:[#allocation2 + $0x2]] }
   0xc   :  { %v43_v16 = vld [vmem:[%s220_s1] sm:$0xff]  ;;  %v47_v17 = vstv %s44_s2 }
   0xd   :  { %v87_v32 = vstv %s116_s22 }
   0xf   :  { %50 = vmatpush.xpose.msra.mxu0 %v40_v2 }
  0x11   :  { %v89_v35 = vstv %s117_s0 }
  0x13   :  { %51 = vmatpush.xpose.msra.mxu0 %v39_v3 }
  0x17   :  { %52 = vmatpush.xpose.msra.mxu0 %v38_v4 }
  0x1b   :  { %53 = vmatpush.xpose.msra.mxu0 %v37_v5 }
  0x1f   :  { %54 = vmatpush.xpose.msra.mxu0 %v36_v6 }
  0x23   :  { %55 = vmatpush.xpose.msra.mxu0 %v35_v7 }
  0x27   :  { %56 = vmatpush.xpose.msra.mxu0 %v34_v8 }
  0x2b   :  { %57 = vmatpush.xpose.msra.mxu0 %v33_v9 }
  0x2f   :  { %58 = vmatpush.xpose.msra.mxu0 %v32_v10 }
  0x33   :  { %59 = vmatpush.xpose.msra.mxu0 %v31_v11 }
  0x37   :  { %60 = vmatpush.xpose.msra.mxu0 %v30_v12 }
  0x3b   :  { %61 = vmatpush.xpose.msra.mxu0 %v29_v13 }
  0x3f   :  { %62 = vmatpush.xpose.msra.mxu0 %v28_v14 }
  0x43   :  { %63 = vmatpush.xpose.msra.mxu0 %v27_v15 }
  0x46   :  { %64 = vmatmul.f32.vlgmr.msra.gmra.mxu0 %v43_v16 }
  0xc3   :  { %v65_v18 = vpop.f32.mrf.mxu0 }
  0xc4   :  { %v66_v19 = vadd.f32 %v65_v18, %v47_v17 }
  0xc6   :  { %v68_v20 = vsub.f32 0.0, %v66_v19 }
  0xc8   :  { %v69_v21 = vmul.f32 1.442695, %v68_v20 }
  0xca   :  { %119 = vpow2.f32 %v69_v21 }
  0xd0   :  { %v120_v22 = vpop.eup %119 }
  0xd1   :  { %v71_v23 = vadd.f32 1.0, %v120_v22 }
  0xd3   :  { %121 = vrcp.f32 %v71_v23  ;;  %v83_v27 = vand.u32 2147483648, %v71_v23  ;;  %v81_v29 = vand.u32 2147483647, %v71_v23  ;;  %vm77_vm1 = vweird.f32 %v71_v23 }
  0xd5   :  { %v84_v31 = vor.u32 1.1754944e-38, %v83_v27  ;;  %vm82_vm3 = vcmp.eq.f32.partialorder %v81_v29, 8.507059e+37 }
  0xd9   :  { %v122_v24 = vpop.eup %121 }
  0xda   :  { %v73_v25 = vmul.f32 %v122_v24, %v71_v23  ;;  %vm78_vm0 = vweird.f32 %v122_v24 }
  0xdb   :  { %vm79_vm2 = vmor %vm77_vm1, %vm78_vm0 }
  0xdc   :  { %v74_v26 = vsub.f32 1.0, %v73_v25 }
  0xde   :  { %v75_v28 = vmul.f32 %v122_v24, %v74_v26 }
  0xe0   :  { %v76_v30 = vadd.f32 %v122_v24, %v75_v28 }
  0xe2   :  { %v80_v33 = vsel %vm79_vm2, %v122_v24, %v76_v30 }
  0xe3   :  { %v85_v34 = vsel %vm82_vm3, %v84_v31, %v80_v33 }
  0xe4   :  { %v88_v36 = vmul.f32 %v87_v32, %v85_v34 }
  0xe6   :  { %v90_v37 = vadd.f32 %v89_v35, %v88_v36 }
  0xe8   :  { %v91_v38 = vsub.f32 0.0, %v90_v37 }
  0xea   :  { %v92_v39 = vmul.f32 1.442695, %v91_v38 }
  0xec   :  { %123 = vpow2.f32 %v92_v39 }
  0xf2   :  { %v124_v40 = vpop.eup %123 }
  0xf3   :  { %v94_v41 = vadd.f32 1.0, %v124_v40 }
  0xf5   :  { %125 = vrcp.f32 %v94_v41  ;;  %v106_v45 = vand.u32 2147483648, %v94_v41  ;;  %v104_v47 = vand.u32 2147483647, %v94_v41  ;;  %vm100_vm5 = vweird.f32 %v94_v41 }
  0xf7   :  { %v107_v49 = vor.u32 1.1754944e-38, %v106_v45  ;;  %vm105_vm7 = vcmp.eq.f32.partialorder %v104_v47, 8.507059e+37 }
  0xfb   :  { %v126_v42 = vpop.eup %125 }
  0xfc   :  { %v96_v43 = vmul.f32 %v126_v42, %v94_v41  ;;  %vm101_vm4 = vweird.f32 %v126_v42 }
  0xfd   :  { %vm102_vm6 = vmor %vm100_vm5, %vm101_vm4 }
  0xfe   :  { %v97_v44 = vsub.f32 1.0, %v96_v43 }
 0x100   :  { %v98_v46 = vmul.f32 %v126_v42, %v97_v44 }
 0x102   :  { %v99_v48 = vadd.f32 %v126_v42, %v98_v46 }
 0x104   :  { %v103_v50 = vsel %vm102_vm6, %v126_v42, %v99_v48 }
 0x105   :  { %v108_v51 = vsel %vm105_vm7, %v107_v49, %v103_v50 }
 0x106   :  { %110 = vst [vmem:[%s222_s3] sm:$0xff] %v108_v51 }
 0x107   :  { %115 = vsyncpa [#allocation3], 1 }

</bundles_post_ra>
